<compile_context>
chip_gen: v7x
topology: tpu7x:2x2x1
jax: 0.10.0
libtpu: 0.0.40
codegen_flags: <defaults>
</compile_context>

<pallas_src>
import math
import jax
import jax.numpy as jnp
from jax import lax
from jax.experimental import pallas as pl
from jax.experimental.pallas import tpu as pltpu

# ---- small, module-consistent config ----
BATCH = 2
NUM_TOKENS = 8          # config.num_tokens (prompt length)
SEQ_LEN = 8             # token sequence length
HIDDEN = 32             # gpt hidden_size
NUM_HEADS = 4           # TaskAttention: nn.MultiheadAttention(hidden, num_heads=4)
HEAD_DIM = HIDDEN // NUM_HEADS
VOCAB = 64
T_TOTAL = NUM_TOKENS + SEQ_LEN


# ----------------------------- Pallas kernel -----------------------------
def task_attention_pallas(params, input_ids, task_embedding):
    """Fused: embedding gather + prompt concat + 4-head TaskAttention.  -> (B, H)."""
    B, S = input_ids.shape
    T = NUM_TOKENS + S
    H = HIDDEN

    def kernel(ids_ref,                      # SMEM scalar-prefetch: (B, S) int32
               tbl_ref, prompt_ref, task_ref, psel_ref,
               wq_ref, bq_ref, wk_ref, bk_ref, wv_ref, bv_ref,
               hsum_ref, wo_ref, bo_ref, out_ref):
        # ---- in-kernel gather + [prompt ; tokens] concat (one-hot / selector matmuls) ----
        # combined[b*T + t] = prompt[t]                           for t <  NUM_TOKENS
        #                   = embed_table[input_ids[b, t-NUM_TOKENS]]  otherwise
        row_iota = lax.broadcasted_iota(jnp.int32, (B * T, VOCAB), 0)
        col_iota = lax.broadcasted_iota(jnp.int32, (B * T, VOCAB), 1)
        ids_mat = jnp.full((B * T, VOCAB), -1, jnp.int32)
        for b in range(B):
            for s in range(S):
                r = b * T + NUM_TOKENS + s
                ids_mat = jnp.where(row_iota == r, ids_ref[b, s], ids_mat)
        one_hot = (col_iota == ids_mat).astype(jnp.float32)               # (B*T, VOCAB)
        combined = (jnp.dot(one_hot, tbl_ref[...], preferred_element_type=jnp.float32)
                    + jnp.dot(psel_ref[...], prompt_ref[...],
                              preferred_element_type=jnp.float32))        # (B*T, H)

        # ---- projections: three independent tiny matmuls (MXU has huge slack) ----
        q = jnp.dot(task_ref[...], wq_ref[...],
                    preferred_element_type=jnp.float32) + bq_ref[...]     # (B, H), scale folded
        k = jnp.dot(combined, wk_ref[...],
                    preferred_element_type=jnp.float32) + bk_ref[...]     # (B*T, H)
        v = jnp.dot(combined, wv_ref[...],
                    preferred_element_type=jnp.float32) + bv_ref[...]     # (B*T, H)

        # ---- per-head scores via the precomputed block-diagonal head-sum matrix ----
        # After this matmul each lane j of `scores` holds the score of head(j), so the
        # softmax over T and the weighted sum of V are pure per-lane VPU ops.
        prod = q.reshape(B, 1, H) * k.reshape(B, T, H)                    # (B, T, H)
        scores = jnp.dot(prod.reshape(B * T, H), hsum_ref[...],
                         preferred_element_type=jnp.float32).reshape(B, T, H)

        m = jnp.max(scores, axis=1, keepdims=True)                        # (B, 1, H)
        p = jnp.exp(scores - m)
        denom = jnp.sum(p, axis=1, keepdims=True)                         # (B, 1, H)
        p = p / denom                                                     # exact softmax divide
        attn = jnp.sum(p * v.reshape(B, T, H), axis=1)                    # (B, H)

        # Output projection; lane-dense (B, H) store.
        out_ref[...] = jnp.dot(attn, wo_ref[...],
                               preferred_element_type=jnp.float32) + bo_ref[...]

    def full2d(shape):
        return pl.BlockSpec(shape, lambda i, ids: (0, 0))

    grid_spec = pltpu.PrefetchScalarGridSpec(
        num_scalar_prefetch=1,                 # input_ids -> SMEM
        grid=(1,),
        in_specs=[
            full2d((VOCAB, H)),                # embed_table
            full2d((NUM_TOKENS, H)),           # prompt_embedding
            full2d((B, H)),                    # task_embedding (queries)
            full2d((B * T, NUM_TOKENS)),       # prompt-row selector (0/1 constant)
            full2d((H, H)), full2d((1, H)),    # wq (scale folded), bq (scale folded)
            full2d((H, H)), full2d((1, H)),    # wk, bk
            full2d((H, H)), full2d((1, H)),    # wv, bv
            full2d((H, H)),                    # head_sum (0/1 constant)
            full2d((H, H)), full2d((1, H)),    # wo, bo
        ],
        out_specs=pl.BlockSpec((B, H), lambda i, ids: (0, 0)),
    )

    return pl.pallas_call(
        kernel,
        out_shape=jax.ShapeDtypeStruct((B, H), jnp.float32),
        grid_spec=grid_spec,
        compiler_params=pltpu.CompilerParams(dimension_semantics=("arbitrary",)),
    )(input_ids,
      params["embed_table"], params["prompt_embedding"], task_embedding,
      params["prompt_sel"],
      params["wq_scaled"], params["bq_scaled"],
      params["wk"], params["bk"], params["wv"], params["bv"],
      params["head_sum"], params["wo"], params["bo"])


# ----------------------------- forward (kernel + trivial glue) -----------------------------
def dynamic_prompt_tuning_forward(params, input_ids, attention_mask=None,
                                  labels=None, task_embedding=None):
    B = input_ids.shape[0]

    # prompt broadcast + embedding gather + concat + TaskAttention: all inside the kernel.
    attn_out = task_attention_pallas(params, input_ids, task_embedding)    # (B, H)

    if attention_mask is not None:
        prompt_attention = jnp.ones((B, NUM_TOKENS), attention_mask.dtype)
        attention_mask = jnp.concatenate([prompt_attention, attention_mask], axis=1)
    if labels is not None:
        prompt_labels = jnp.full((B, NUM_TOKENS), -100, labels.dtype)
        labels = jnp.concatenate([prompt_labels, labels], axis=1)

    # TODO(synk): self.gpt(inputs_embeds=..., attention_mask=..., labels=...) — the full
    # pretrained causal-LM forward has no clean single-kernel Pallas equivalent here.
    return {"combined_embeds": attn_out,
            "attention_mask": attention_mask,
            "labels": labels}


# ----------------------------- pure-JAX reference for the kernel -----------------------------
def task_attention_ref(task_embedding, combined, params):
    B, T, H = combined.shape
    q = task_embedding @ params["wq"] + params["bq"]                 # (B, H)
    k = jnp.einsum("bth,hd->btd", combined, params["wk"]) + params["bk"]
    v = jnp.einsum("bth,hd->btd", combined, params["wv"]) + params["bv"]
    qh = q.reshape(B, NUM_HEADS, HEAD_DIM)
    kh = k.reshape(B, T, NUM_HEADS, HEAD_DIM)
    vh = v.reshape(B, T, NUM_HEADS, HEAD_DIM)
    s = jnp.einsum("bnd,btnd->bnt", qh, kh) / math.sqrt(HEAD_DIM)
    p = jax.nn.softmax(s, axis=-1)
    o = jnp.einsum("bnt,btnd->bnd", p, vh).reshape(B, H)
    return o @ params["wo"] + params["bo"]


# ----------------------------- deterministic parameter init -----------------------------
def init_params(key):
    ks = jax.random.split(key, 10)
    params = {
        # nn.Parameter(torch.randn(num_tokens, hidden) / sqrt(hidden))
        "prompt_embedding": jax.random.normal(ks[0], (NUM_TOKENS, HIDDEN), jnp.float32)
                            / math.sqrt(HIDDEN),
        # gpt input embedding table (synthetic)
        "embed_table": jax.random.normal(ks[1], (VOCAB, HIDDEN), jnp.float32) * 0.02,
        # nn.MultiheadAttention in_proj / out_proj (stored pre-transposed: y = x @ W + b)
        "wq": jax.random.normal(ks[2], (HIDDEN, HIDDEN), jnp.float32) / math.sqrt(HIDDEN),
        "wk": jax.random.normal(ks[3], (HIDDEN, HIDDEN), jnp.float32) / math.sqrt(HIDDEN),
        "wv": jax.random.normal(ks[4], (HIDDEN, HIDDEN), jnp.float32) / math.sqrt(HIDDEN),
        "wo": jax.random.normal(ks[5], (HIDDEN, HIDDEN), jnp.float32) / math.sqrt(HIDDEN),
        "bq": jnp.zeros((1, HIDDEN), jnp.float32),
        "bk": jnp.zeros((1, HIDDEN), jnp.float32),
        "bv": jnp.zeros((1, HIDDEN), jnp.float32),
        "bo": jnp.zeros((1, HIDDEN), jnp.float32),
        # self.task_layer (xavier_uniform weight, zero bias) — defined in __init__ but
        # never used in forward(); kept for shape fidelity.
        "task_layer_w": jax.random.uniform(ks[6], (HIDDEN, HIDDEN), jnp.float32,
                                           -math.sqrt(6.0 / (2 * HIDDEN)),
                                           math.sqrt(6.0 / (2 * HIDDEN))),
        "task_layer_b": jnp.zeros((HIDDEN,), jnp.float32),
    }

    # ---- kernel-side constants, built ONCE (hoisted out of the per-call path) ----
    scale = 1.0 / math.sqrt(HEAD_DIM)
    params["wq_scaled"] = params["wq"] * scale            # 1/sqrt(head_dim) folded into q proj
    params["bq_scaled"] = params["bq"] * scale
    head_ids = jnp.arange(HIDDEN) // HEAD_DIM
    params["head_sum"] = (head_ids[:, None] == head_ids[None, :]).astype(jnp.float32)  # (H, H) 0/1
    pos = jnp.arange(BATCH * T_TOTAL) % T_TOTAL
    params["prompt_sel"] = (pos[:, None] == jnp.arange(NUM_TOKENS)[None, :]
                            ).astype(jnp.float32)                                      # (B*T, NT) 0/1
    return params


if __name__ == "__main__":
    key = jax.random.PRNGKey(0)
    pkey, ikey, tkey = jax.random.split(key, 3)
    params = init_params(pkey)

    input_ids = jax.random.randint(ikey, (BATCH, SEQ_LEN), 0, VOCAB, dtype=jnp.int32)
    attention_mask = jnp.ones((BATCH, SEQ_LEN), jnp.int32)
    labels = input_ids
    task_embedding = jax.random.normal(tkey, (BATCH, HIDDEN), jnp.float32)

    out = dynamic_prompt_tuning_forward(params, input_ids,
                                        attention_mask=attention_mask,
                                        labels=labels,
                                        task_embedding=task_embedding)
    jax.block_until_ready(out["combined_embeds"])

    # verify the fused Pallas path against a pure-JAX reference
    prompt = jnp.broadcast_to(params["prompt_embedding"][None], (BATCH, NUM_TOKENS, HIDDEN))
    embeds = jnp.take(params["embed_table"], input_ids, axis=0)
    combined = jnp.concatenate([prompt, embeds], axis=1)
    ref = task_attention_ref(task_embedding, combined, params)

    assert out["combined_embeds"].shape == (BATCH, HIDDEN)
    assert out["attention_mask"].shape == (BATCH, NUM_TOKENS + SEQ_LEN)
    assert out["labels"].shape == (BATCH, NUM_TOKENS + SEQ_LEN)
    # exact softmax divide now; residual tolerance only covers MXU default-precision
    # rounding differences between the in-kernel one-hot gather path and jnp.take.
    assert jnp.allclose(out["combined_embeds"], ref, atol=5e-3, rtol=5e-3), "mismatch vs reference"

    print("KERNEL_OK")
</pallas_src>

<mosaic_0001>
module attributes {stable_mosaic.version = 11 : i64} {
  func.func @kernel(%arg0: i32, %arg1: memref<2x8xi32, #tpu.memory_space<smem>>, %arg2: memref<64x32xf32, #tpu.memory_space<vmem>>, %arg3: memref<8x32xf32, #tpu.memory_space<vmem>>, %arg4: memref<2x32xf32, #tpu.memory_space<vmem>>, %arg5: memref<32x8xf32, #tpu.memory_space<vmem>>, %arg6: memref<32x32xf32, #tpu.memory_space<vmem>>, %arg7: memref<1x32xf32, #tpu.memory_space<vmem>>, %arg8: memref<32x32xf32, #tpu.memory_space<vmem>>, %arg9: memref<1x32xf32, #tpu.memory_space<vmem>>, %arg10: memref<32x32xf32, #tpu.memory_space<vmem>>, %arg11: memref<1x32xf32, #tpu.memory_space<vmem>>, %arg12: memref<32x32xf32, #tpu.memory_space<vmem>>, %arg13: memref<32x32xf32, #tpu.memory_space<vmem>>, %arg14: memref<1x32xf32, #tpu.memory_space<vmem>>, %arg15: memref<2x32xf32, #tpu.memory_space<vmem>>) attributes {dimension_semantics = [#tpu.dimension_semantics<arbitrary>], iteration_bounds = array<i64: 1>, scalar_prefetch = 1 : i64, scratch_operands = 0 : i64, tpu.core_type = #tpu.core_type<tc>, window_params = [{pipeline_mode = #tpu.pipeline_mode<synchronous>, transform_indices = @transform_0, window_bounds = array<i64: 64, 32>}, {pipeline_mode = #tpu.pipeline_mode<synchronous>, transform_indices = @transform_1, window_bounds = array<i64: 8, 32>}, {pipeline_mode = #tpu.pipeline_mode<synchronous>, transform_indices = @transform_2, window_bounds = array<i64: 2, 32>}, {pipeline_mode = #tpu.pipeline_mode<synchronous>, transform_indices = @transform_3, window_bounds = array<i64: 32, 8>}, {pipeline_mode = #tpu.pipeline_mode<synchronous>, transform_indices = @transform_4, window_bounds = array<i64: 32, 32>}, {pipeline_mode = #tpu.pipeline_mode<synchronous>, transform_indices = @transform_5, window_bounds = array<i64: 1, 32>}, {pipeline_mode = #tpu.pipeline_mode<synchronous>, transform_indices = @transform_6, window_bounds = array<i64: 32, 32>}, {pipeline_mode = #tpu.pipeline_mode<synchronous>, transform_indices = @transform_7, window_bounds = array<i64: 1, 32>}, {pipeline_mode = #tpu.pipeline_mode<synchronous>, transform_indices = @transform_8, window_bounds = array<i64: 32, 32>}, {pipeline_mode = #tpu.pipeline_mode<synchronous>, transform_indices = @transform_9, window_bounds = array<i64: 1, 32>}, {pipeline_mode = #tpu.pipeline_mode<synchronous>, transform_indices = @transform_10, window_bounds = array<i64: 32, 32>}, {pipeline_mode = #tpu.pipeline_mode<synchronous>, transform_indices = @transform_11, window_bounds = array<i64: 32, 32>}, {pipeline_mode = #tpu.pipeline_mode<synchronous>, transform_indices = @transform_12, window_bounds = array<i64: 1, 32>}, {pipeline_mode = #tpu.pipeline_mode<synchronous>, transform_indices = @transform_13, window_bounds = array<i64: 2, 32>}]} {
    %0 = tpu.iota {dimensions = array<i32: 0>} : vector<32x64xi32>
    %1 = tpu.iota {dimensions = array<i32: 1>} : vector<32x64xi32>
    %c-1_i32 = arith.constant -1 : i32
    %2 = vector.broadcast %c-1_i32 : i32 to vector<32x64xi32>
    %c8_i32 = arith.constant 8 : i32
    %3 = vector.broadcast %c8_i32 : i32 to vector<32x64xi32>
    %4 = arith.cmpi eq, %0, %3 : vector<32x64xi32>
    %c0 = arith.constant 0 : index
    %c0_0 = arith.constant 0 : index
    %5 = memref.load %arg1[%c0, %c0_0] : memref<2x8xi32, #tpu.memory_space<smem>>
    %6 = vector.broadcast %5 : i32 to vector<32x64xi32>
    %7 = arith.select %4, %6, %2 : vector<32x64xi1>, vector<32x64xi32>
    %c9_i32 = arith.constant 9 : i32
    %8 = vector.broadcast %c9_i32 : i32 to vector<32x64xi32>
    %9 = arith.cmpi eq, %0, %8 : vector<32x64xi32>
    %c0_1 = arith.constant 0 : index
    %c1 = arith.constant 1 : index
    %10 = memref.load %arg1[%c0_1, %c1] : memref<2x8xi32, #tpu.memory_space<smem>>
    %11 = vector.broadcast %10 : i32 to vector<32x64xi32>
    %12 = arith.select %9, %11, %7 : vector<32x64xi1>, vector<32x64xi32>
    %c10_i32 = arith.constant 10 : i32
    %13 = vector.broadcast %c10_i32 : i32 to vector<32x64xi32>
    %14 = arith.cmpi eq, %0, %13 : vector<32x64xi32>
    %c0_2 = arith.constant 0 : index
    %c2 = arith.constant 2 : index
    %15 = memref.load %arg1[%c0_2, %c2] : memref<2x8xi32, #tpu.memory_space<smem>>
    %16 = vector.broadcast %15 : i32 to vector<32x64xi32>
    %17 = arith.select %14, %16, %12 : vector<32x64xi1>, vector<32x64xi32>
    %c11_i32 = arith.constant 11 : i32
    %18 = vector.broadcast %c11_i32 : i32 to vector<32x64xi32>
    %19 = arith.cmpi eq, %0, %18 : vector<32x64xi32>
    %c0_3 = arith.constant 0 : index
    %c3 = arith.constant 3 : index
    %20 = memref.load %arg1[%c0_3, %c3] : memref<2x8xi32, #tpu.memory_space<smem>>
    %21 = vector.broadcast %20 : i32 to vector<32x64xi32>
    %22 = arith.select %19, %21, %17 : vector<32x64xi1>, vector<32x64xi32>
    %c12_i32 = arith.constant 12 : i32
    %23 = vector.broadcast %c12_i32 : i32 to vector<32x64xi32>
    %24 = arith.cmpi eq, %0, %23 : vector<32x64xi32>
    %c0_4 = arith.constant 0 : index
    %c4 = arith.constant 4 : index
    %25 = memref.load %arg1[%c0_4, %c4] : memref<2x8xi32, #tpu.memory_space<smem>>
    %26 = vector.broadcast %25 : i32 to vector<32x64xi32>
    %27 = arith.select %24, %26, %22 : vector<32x64xi1>, vector<32x64xi32>
    %c13_i32 = arith.constant 13 : i32
    %28 = vector.broadcast %c13_i32 : i32 to vector<32x64xi32>
    %29 = arith.cmpi eq, %0, %28 : vector<32x64xi32>
    %c0_5 = arith.constant 0 : index
    %c5 = arith.constant 5 : index
    %30 = memref.load %arg1[%c0_5, %c5] : memref<2x8xi32, #tpu.memory_space<smem>>
    %31 = vector.broadcast %30 : i32 to vector<32x64xi32>
    %32 = arith.select %29, %31, %27 : vector<32x64xi1>, vector<32x64xi32>
    %c14_i32 = arith.constant 14 : i32
    %33 = vector.broadcast %c14_i32 : i32 to vector<32x64xi32>
    %34 = arith.cmpi eq, %0, %33 : vector<32x64xi32>
    %c0_6 = arith.constant 0 : index
    %c6 = arith.constant 6 : index
    %35 = memref.load %arg1[%c0_6, %c6] : memref<2x8xi32, #tpu.memory_space<smem>>
    %36 = vector.broadcast %35 : i32 to vector<32x64xi32>
    %37 = arith.select %34, %36, %32 : vector<32x64xi1>, vector<32x64xi32>
    %c15_i32 = arith.constant 15 : i32
    %38 = vector.broadcast %c15_i32 : i32 to vector<32x64xi32>
    %39 = arith.cmpi eq, %0, %38 : vector<32x64xi32>
    %c0_7 = arith.constant 0 : index
    %c7 = arith.constant 7 : index
    %40 = memref.load %arg1[%c0_7, %c7] : memref<2x8xi32, #tpu.memory_space<smem>>
    %41 = vector.broadcast %40 : i32 to vector<32x64xi32>
    %42 = arith.select %39, %41, %37 : vector<32x64xi1>, vector<32x64xi32>
    %c24_i32 = arith.constant 24 : i32
    %43 = vector.broadcast %c24_i32 : i32 to vector<32x64xi32>
    %44 = arith.cmpi eq, %0, %43 : vector<32x64xi32>
    %c1_8 = arith.constant 1 : index
    %c0_9 = arith.constant 0 : index
    %45 = memref.load %arg1[%c1_8, %c0_9] : memref<2x8xi32, #tpu.memory_space<smem>>
    %46 = vector.broadcast %45 : i32 to vector<32x64xi32>
    %47 = arith.select %44, %46, %42 : vector<32x64xi1>, vector<32x64xi32>
    %c25_i32 = arith.constant 25 : i32
    %48 = vector.broadcast %c25_i32 : i32 to vector<32x64xi32>
    %49 = arith.cmpi eq, %0, %48 : vector<32x64xi32>
    %c1_10 = arith.constant 1 : index
    %c1_11 = arith.constant 1 : index
    %50 = memref.load %arg1[%c1_10, %c1_11] : memref<2x8xi32, #tpu.memory_space<smem>>
    %51 = vector.broadcast %50 : i32 to vector<32x64xi32>
    %52 = arith.select %49, %51, %47 : vector<32x64xi1>, vector<32x64xi32>
    %c26_i32 = arith.constant 26 : i32
    %53 = vector.broadcast %c26_i32 : i32 to vector<32x64xi32>
    %54 = arith.cmpi eq, %0, %53 : vector<32x64xi32>
    %c1_12 = arith.constant 1 : index
    %c2_13 = arith.constant 2 : index
    %55 = memref.load %arg1[%c1_12, %c2_13] : memref<2x8xi32, #tpu.memory_space<smem>>
    %56 = vector.broadcast %55 : i32 to vector<32x64xi32>
    %57 = arith.select %54, %56, %52 : vector<32x64xi1>, vector<32x64xi32>
    %c27_i32 = arith.constant 27 : i32
    %58 = vector.broadcast %c27_i32 : i32 to vector<32x64xi32>
    %59 = arith.cmpi eq, %0, %58 : vector<32x64xi32>
    %c1_14 = arith.constant 1 : index
    %c3_15 = arith.constant 3 : index
    %60 = memref.load %arg1[%c1_14, %c3_15] : memref<2x8xi32, #tpu.memory_space<smem>>
    %61 = vector.broadcast %60 : i32 to vector<32x64xi32>
    %62 = arith.select %59, %61, %57 : vector<32x64xi1>, vector<32x64xi32>
    %c28_i32 = arith.constant 28 : i32
    %63 = vector.broadcast %c28_i32 : i32 to vector<32x64xi32>
    %64 = arith.cmpi eq, %0, %63 : vector<32x64xi32>
    %c1_16 = arith.constant 1 : index
    %c4_17 = arith.constant 4 : index
    %65 = memref.load %arg1[%c1_16, %c4_17] : memref<2x8xi32, #tpu.memory_space<smem>>
    %66 = vector.broadcast %65 : i32 to vector<32x64xi32>
    %67 = arith.select %64, %66, %62 : vector<32x64xi1>, vector<32x64xi32>
    %c29_i32 = arith.constant 29 : i32
    %68 = vector.broadcast %c29_i32 : i32 to vector<32x64xi32>
    %69 = arith.cmpi eq, %0, %68 : vector<32x64xi32>
    %c1_18 = arith.constant 1 : index
    %c5_19 = arith.constant 5 : index
    %70 = memref.load %arg1[%c1_18, %c5_19] : memref<2x8xi32, #tpu.memory_space<smem>>
    %71 = vector.broadcast %70 : i32 to vector<32x64xi32>
    %72 = arith.select %69, %71, %67 : vector<32x64xi1>, vector<32x64xi32>
    %c30_i32 = arith.constant 30 : i32
    %73 = vector.broadcast %c30_i32 : i32 to vector<32x64xi32>
    %74 = arith.cmpi eq, %0, %73 : vector<32x64xi32>
    %c1_20 = arith.constant 1 : index
    %c6_21 = arith.constant 6 : index
    %75 = memref.load %arg1[%c1_20, %c6_21] : memref<2x8xi32, #tpu.memory_space<smem>>
    %76 = vector.broadcast %75 : i32 to vector<32x64xi32>
    %77 = arith.select %74, %76, %72 : vector<32x64xi1>, vector<32x64xi32>
    %c31_i32 = arith.constant 31 : i32
    %78 = vector.broadcast %c31_i32 : i32 to vector<32x64xi32>
    %79 = arith.cmpi eq, %0, %78 : vector<32x64xi32>
    %c1_22 = arith.constant 1 : index
    %c7_23 = arith.constant 7 : index
    %80 = memref.load %arg1[%c1_22, %c7_23] : memref<2x8xi32, #tpu.memory_space<smem>>
    %81 = vector.broadcast %80 : i32 to vector<32x64xi32>
    %82 = arith.select %79, %81, %77 : vector<32x64xi1>, vector<32x64xi32>
    %83 = arith.cmpi eq, %1, %82 : vector<32x64xi32>
    %84 = arith.extui %83 : vector<32x64xi1> to vector<32x64xi32>
    %85 = arith.sitofp %84 : vector<32x64xi32> to vector<32x64xf32>
    %c0_24 = arith.constant 0 : index
    %c0_25 = arith.constant 0 : index
    %86 = vector.load %arg2[%c0_24, %c0_25] : memref<64x32xf32, #tpu.memory_space<vmem>>, vector<64x32xf32>
    %cst = arith.constant dense<0.000000e+00> : vector<32x32xf32>
    %87 = tpu.matmul %85, %86, %cst {dimension_numbers = #tpu.dot_dimension_numbers<[1], [0], [0], [1], [0, 0, 1, 1], [], []>} : vector<32x64xf32>, vector<64x32xf32>, vector<32x32xf32> -> vector<32x32xf32>
    %c0_26 = arith.constant 0 : index
    %c0_27 = arith.constant 0 : index
    %88 = vector.load %arg5[%c0_26, %c0_27] : memref<32x8xf32, #tpu.memory_space<vmem>>, vector<32x8xf32>
    %c0_28 = arith.constant 0 : index
    %c0_29 = arith.constant 0 : index
    %89 = vector.load %arg3[%c0_28, %c0_29] : memref<8x32xf32, #tpu.memory_space<vmem>>, vector<8x32xf32>
    %cst_30 = arith.constant dense<0.000000e+00> : vector<32x32xf32>
    %90 = tpu.matmul %88, %89, %cst_30 {dimension_numbers = #tpu.dot_dimension_numbers<[1], [0], [0], [1], [0, 0, 1, 1], [], []>} : vector<32x8xf32>, vector<8x32xf32>, vector<32x32xf32> -> vector<32x32xf32>
    %91 = arith.addf %87, %90 : vector<32x32xf32>
    %c0_31 = arith.constant 0 : index
    %c0_32 = arith.constant 0 : index
    %92 = vector.load %arg4[%c0_31, %c0_32] : memref<2x32xf32, #tpu.memory_space<vmem>>, vector<2x32xf32>
    %c0_33 = arith.constant 0 : index
    %c0_34 = arith.constant 0 : index
    %93 = vector.load %arg6[%c0_33, %c0_34] : memref<32x32xf32, #tpu.memory_space<vmem>>, vector<32x32xf32>
    %cst_35 = arith.constant dense<0.000000e+00> : vector<2x32xf32>
    %94 = tpu.matmul %92, %93, %cst_35 {dimension_numbers = #tpu.dot_dimension_numbers<[1], [0], [0], [1], [0, 0, 1, 1], [], []>} : vector<2x32xf32>, vector<32x32xf32>, vector<2x32xf32> -> vector<2x32xf32>
    %c0_36 = arith.constant 0 : index
    %c0_37 = arith.constant 0 : index
    %95 = vector.load %arg7[%c0_36, %c0_37] : memref<1x32xf32, #tpu.memory_space<vmem>>, vector<1x32xf32>
    %96 = vector.broadcast %95 : vector<1x32xf32> to vector<2x32xf32>
    %97 = arith.addf %94, %96 : vector<2x32xf32>
    %c0_38 = arith.constant 0 : index
    %c0_39 = arith.constant 0 : index
    %98 = vector.load %arg8[%c0_38, %c0_39] : memref<32x32xf32, #tpu.memory_space<vmem>>, vector<32x32xf32>
    %cst_40 = arith.constant dense<0.000000e+00> : vector<32x32xf32>
    %99 = tpu.matmul %91, %98, %cst_40 {dimension_numbers = #tpu.dot_dimension_numbers<[1], [0], [0], [1], [0, 0, 1, 1], [], []>} : vector<32x32xf32>, vector<32x32xf32>, vector<32x32xf32> -> vector<32x32xf32>
    %c0_41 = arith.constant 0 : index
    %c0_42 = arith.constant 0 : index
    %100 = vector.load %arg9[%c0_41, %c0_42] : memref<1x32xf32, #tpu.memory_space<vmem>>, vector<1x32xf32>
    %101 = vector.broadcast %100 : vector<1x32xf32> to vector<32x32xf32>
    %102 = arith.addf %99, %101 : vector<32x32xf32>
    %c0_43 = arith.constant 0 : index
    %c0_44 = arith.constant 0 : index
    %103 = vector.load %arg10[%c0_43, %c0_44] : memref<32x32xf32, #tpu.memory_space<vmem>>, vector<32x32xf32>
    %cst_45 = arith.constant dense<0.000000e+00> : vector<32x32xf32>
    %104 = tpu.matmul %91, %103, %cst_45 {dimension_numbers = #tpu.dot_dimension_numbers<[1], [0], [0], [1], [0, 0, 1, 1], [], []>} : vector<32x32xf32>, vector<32x32xf32>, vector<32x32xf32> -> vector<32x32xf32>
    %c0_46 = arith.constant 0 : index
    %c0_47 = arith.constant 0 : index
    %105 = vector.load %arg11[%c0_46, %c0_47] : memref<1x32xf32, #tpu.memory_space<vmem>>, vector<1x32xf32>
    %106 = vector.broadcast %105 : vector<1x32xf32> to vector<32x32xf32>
    %107 = arith.addf %104, %106 : vector<32x32xf32>
    %108 = vector.shape_cast %97 : vector<2x32xf32> to vector<2x1x32xf32>
    %109 = vector.shape_cast %102 : vector<32x32xf32> to vector<2x16x32xf32>
    %110 = vector.broadcast %108 : vector<2x1x32xf32> to vector<2x16x32xf32>
    %111 = arith.mulf %110, %109 : vector<2x16x32xf32>
    %112 = vector.shape_cast %111 : vector<2x16x32xf32> to vector<32x32xf32>
    %c0_48 = arith.constant 0 : index
    %c0_49 = arith.constant 0 : index
    %113 = vector.load %arg12[%c0_48, %c0_49] : memref<32x32xf32, #tpu.memory_space<vmem>>, vector<32x32xf32>
    %cst_50 = arith.constant dense<0.000000e+00> : vector<32x32xf32>
    %114 = tpu.matmul %112, %113, %cst_50 {dimension_numbers = #tpu.dot_dimension_numbers<[1], [0], [0], [1], [0, 0, 1, 1], [], []>} : vector<32x32xf32>, vector<32x32xf32>, vector<32x32xf32> -> vector<32x32xf32>
    %115 = vector.shape_cast %114 : vector<32x32xf32> to vector<2x16x32xf32>
    %cst_51 = arith.constant dense<0xFF800000> : vector<2x32xf32>
    %116 = vector.multi_reduction <maximumf>, %115, %cst_51 [1] : vector<2x16x32xf32> to vector<2x32xf32>
    %117 = vector.shape_cast %116 : vector<2x32xf32> to vector<2x1x32xf32>
    %118 = vector.broadcast %117 : vector<2x1x32xf32> to vector<2x16x32xf32>
    %119 = arith.subf %115, %118 : vector<2x16x32xf32>
    %120 = math.exp %119 : vector<2x16x32xf32>
    %cst_52 = arith.constant dense<0.000000e+00> : vector<2x32xf32>
    %121 = vector.multi_reduction <add>, %120, %cst_52 [1] : vector<2x16x32xf32> to vector<2x32xf32>
    %122 = vector.shape_cast %121 : vector<2x32xf32> to vector<2x1x32xf32>
    %123 = vector.broadcast %122 : vector<2x1x32xf32> to vector<2x16x32xf32>
    %124 = arith.divf %120, %123 : vector<2x16x32xf32>
    %125 = vector.shape_cast %107 : vector<32x32xf32> to vector<2x16x32xf32>
    %126 = arith.mulf %124, %125 : vector<2x16x32xf32>
    %cst_53 = arith.constant dense<0.000000e+00> : vector<2x32xf32>
    %127 = vector.multi_reduction <add>, %126, %cst_53 [1] : vector<2x16x32xf32> to vector<2x32xf32>
    %c0_54 = arith.constant 0 : index
    %c0_55 = arith.constant 0 : index
    %128 = vector.load %arg13[%c0_54, %c0_55] : memref<32x32xf32, #tpu.memory_space<vmem>>, vector<32x32xf32>
    %cst_56 = arith.constant dense<0.000000e+00> : vector<2x32xf32>
    %129 = tpu.matmul %127, %128, %cst_56 {dimension_numbers = #tpu.dot_dimension_numbers<[1], [0], [0], [1], [0, 0, 1, 1], [], []>} : vector<2x32xf32>, vector<32x32xf32>, vector<2x32xf32> -> vector<2x32xf32>
    %c0_57 = arith.constant 0 : index
    %c0_58 = arith.constant 0 : index
    %130 = vector.load %arg14[%c0_57, %c0_58] : memref<1x32xf32, #tpu.memory_space<vmem>>, vector<1x32xf32>
    %131 = vector.broadcast %130 : vector<1x32xf32> to vector<2x32xf32>
    %132 = arith.addf %129, %131 : vector<2x32xf32>
    %c0_59 = arith.constant 0 : index
    %c0_60 = arith.constant 0 : index
    %133 = vector.load %arg15[%c0_59, %c0_60] : memref<2x32xf32, #tpu.memory_space<vmem>>, vector<2x32xf32>
    tpu.vector_store %arg15[%c0_59, %c0_60], %132 {strides = array<i32>} : memref<2x32xf32, #tpu.memory_space<vmem>>, vector<2x32xf32>,
    return
  }
  func.func @transform_0(%arg0: i32, %arg1: memref<2x8xi32, #tpu.memory_space<smem>>) -> (i32, i32) {
    %c0_i32 = arith.constant 0 : i32
    %c0_i32_0 = arith.constant 0 : i32
    %c0_i32_1 = arith.constant 0 : i32
    return %c0_i32, %c0_i32_0 : i32, i32
  }
  func.func @transform_1(%arg0: i32, %arg1: memref<2x8xi32, #tpu.memory_space<smem>>) -> (i32, i32) {
    %c0_i32 = arith.constant 0 : i32
    %c0_i32_0 = arith.constant 0 : i32
    %c0_i32_1 = arith.constant 0 : i32
    return %c0_i32, %c0_i32_0 : i32, i32
  }
  func.func @transform_2(%arg0: i32, %arg1: memref<2x8xi32, #tpu.memory_space<smem>>) -> (i32, i32) {
    %c0_i32 = arith.constant 0 : i32
    %c0_i32_0 = arith.constant 0 : i32
    %c0_i32_1 = arith.constant 0 : i32
    return %c0_i32, %c0_i32_0 : i32, i32
  }
  func.func @transform_3(%arg0: i32, %arg1: memref<2x8xi32, #tpu.memory_space<smem>>) -> (i32, i32) {
    %c0_i32 = arith.constant 0 : i32
    %c0_i32_0 = arith.constant 0 : i32
    %c0_i32_1 = arith.constant 0 : i32
    return %c0_i32, %c0_i32_0 : i32, i32
  }
  func.func @transform_4(%arg0: i32, %arg1: memref<2x8xi32, #tpu.memory_space<smem>>) -> (i32, i32) {
    %c0_i32 = arith.constant 0 : i32
    %c0_i32_0 = arith.constant 0 : i32
    %c0_i32_1 = arith.constant 0 : i32
    return %c0_i32, %c0_i32_0 : i32, i32
  }
  func.func @transform_5(%arg0: i32, %arg1: memref<2x8xi32, #tpu.memory_space<smem>>) -> (i32, i32) {
    %c0_i32 = arith.constant 0 : i32
    %c0_i32_0 = arith.constant 0 : i32
    %c0_i32_1 = arith.constant 0 : i32
    return %c0_i32, %c0_i32_0 : i32, i32
  }
  func.func @transform_6(%arg0: i32, %arg1: memref<2x8xi32, #tpu.memory_space<smem>>) -> (i32, i32) {
    %c0_i32 = arith.constant 0 : i32
    %c0_i32_0 = arith.constant 0 : i32
    %c0_i32_1 = arith.constant 0 : i32
    return %c0_i32, %c0_i32_0 : i32, i32
  }
  func.func @transform_7(%arg0: i32, %arg1: memref<2x8xi32, #tpu.memory_space<smem>>) -> (i32, i32) {
    %c0_i32 = arith.constant 0 : i32
    %c0_i32_0 = arith.constant 0 : i32
    %c0_i32_1 = arith.constant 0 : i32
    return %c0_i32, %c0_i32_0 : i32, i32
  }
  func.func @transform_8(%arg0: i32, %arg1: memref<2x8xi32, #tpu.memory_space<smem>>) -> (i32, i32) {
    %c0_i32 = arith.constant 0 : i32
    %c0_i32_0 = arith.constant 0 : i32
    %c0_i32_1 = arith.constant 0 : i32
    return %c0_i32, %c0_i32_0 : i32, i32
  }
  func.func @transform_9(%arg0: i32, %arg1: memref<2x8xi32, #tpu.memory_space<smem>>) -> (i32, i32) {
    %c0_i32 = arith.constant 0 : i32
    %c0_i32_0 = arith.constant 0 : i32
    %c0_i32_1 = arith.constant 0 : i32
    return %c0_i32, %c0_i32_0 : i32, i32
  }
  func.func @transform_10(%arg0: i32, %arg1: memref<2x8xi32, #tpu.memory_space<smem>>) -> (i32, i32) {
    %c0_i32 = arith.constant 0 : i32
    %c0_i32_0 = arith.constant 0 : i32
    %c0_i32_1 = arith.constant 0 : i32
    return %c0_i32, %c0_i32_0 : i32, i32
  }
  func.func @transform_11(%arg0: i32, %arg1: memref<2x8xi32, #tpu.memory_space<smem>>) -> (i32, i32) {
    %c0_i32 = arith.constant 0 : i32
    %c0_i32_0 = arith.constant 0 : i32
    %c0_i32_1 = arith.constant 0 : i32
    return %c0_i32, %c0_i32_0 : i32, i32
  }
  func.func @transform_12(%arg0: i32, %arg1: memref<2x8xi32, #tpu.memory_space<smem>>) -> (i32, i32) {
    %c0_i32 = arith.constant 0 : i32
    %c0_i32_0 = arith.constant 0 : i32
    %c0_i32_1 = arith.constant 0 : i32
    return %c0_i32, %c0_i32_0 : i32, i32
  }
  func.func @transform_13(%arg0: i32, %arg1: memref<2x8xi32, #tpu.memory_space<smem>>) -> (i32, i32) {
    %c0_i32 = arith.constant 0 : i32
    %c0_i32_0 = arith.constant 0 : i32
    %c0_i32_1 = arith.constant 0 : i32
    return %c0_i32, %c0_i32_0 : i32, i32
  }
}

</mosaic_0001>

<bundles_post_ra>
// kernel: tpu_custom_call.1
= control target key start
LH: loop header
LB: loop body
LE: loop exit
PB: predicated region body
PF: predicated region fallthrough
CT: control target
= control target key end

     0   :  { %s1895_s0 = inlined_call_operand.vmem [shape: s32[2,8], index: 0, kind: input, shape index: {}]   ;;  %s1896_s1 = inlined_call_operand.vmem [shape: f32[64,32], index: 1, kind: input, shape index: {}]   ;;  %s1897_s2 = inlined_call_operand.hbm [shape: f32[8,32], index: 2, kind: input, shape index: {}]   ;;  %s1898_s3 = inlined_call_operand.hbm [shape: f32[2,32], index: 3, kind: input, shape index: {}]   ;;  %s1899_s4 = inlined_call_operand.vmem [shape: f32[32,8], index: 4, kind: input, shape index: {}]   ;;  %s1900_s5 = inlined_call_operand.vmem [shape: f32[32,32], index: 5, kind: input, shape index: {}]   ;;  %s1901_s6 = inlined_call_operand.hbm [shape: f32[1,32], index: 6, kind: input, shape index: {}]   ;;  %s1902_s7 = inlined_call_operand.vmem [shape: f32[32,32], index: 7, kind: input, shape index: {}]   ;;  %s1903_s8 = inlined_call_operand.vmem [shape: f32[1,32], index: 8, kind: input, shape index: {}]   ;;  %s1904_s9 = inlined_call_operand.vmem [shape: f32[32,32], index: 9, kind: input, shape index: {}]   ;;  %s1905_s10 = inlined_call_operand.vmem [shape: f32[1,32], index: 10, kind: input, shape index: {}]   ;;  %s1906_s11 = inlined_call_operand.vmem [shape: f32[32,32], index: 11, kind: input, shape index: {}]   ;;  %s1907_s12 = inlined_call_operand.hbm [shape: f32[32,32], index: 12, kind: input, shape index: {}]   ;;  %s1908_s13 = inlined_call_operand.vmem [shape: f32[1,32], index: 13, kind: input, shape index: {}]   ;;  %s1909_s14 = inlined_call_operand.hbm [shape: f32[2,32], index: 14, kind: output, shape index: {}]  }
   0x1   :  { %s19_s15 = sshll.u32 %s1895_s0, 4  ;;  %s20_s15 = int_to_ptr.vmem [resolvable:$true] %s19_s15 }
   0x2   :  { %s1365_s16 = scalar_lea.vmem %s20_s15, 32  ;;  %p1370_p1 = scmp.lt.s32.totalorder %s20_s15, %s20_s15 }
   0x3   :  { %p1366_p0 = scmp.ne.s32.totalorder %s20_s15, %s1365_s16  ;;  %p1371_p2 = scmp.lt.s32.totalorder %s1365_s16, %s1365_s16 }
   0x5   :  { %p1372_p3 = por %p1371_p2, %p1370_p1 }
   0x7   :  { %p1373_p4 = pnand %p1372_p3, %p1366_p0 }
   0x9   :  { %1376 = shalt.err (!%p1373_p4)  }
   0xa   :  { %s1497_s17 = smov [#allocation3]  }
   0xb   :  { %22 = dma.vmem_to_smem %s20_s15, 32, %s1497_s17, [#allocation2] }
   0xc   :  { %1487 = dma.done.wait [#allocation2], 32 }
   0xd   :  { %1488 = vsyncadd [#allocation2], 4294967264 }
   0xe   :  { %24 = sfence }
   0xf   :  { %25 = vsyncpa [#allocation5], 0 }
  0x10   :  { %26 = vsyncpa [#allocation8], 0 }
  0x11   :  { %27 = vsyncpa [#allocation11], 0 }
  0x12   :  { %28 = vsyncpa [#allocation6], 0  ;;  %s1498_s18 = smov [#allocation7]   ;;  %s1499_s0 = smov [#allocation4]  }
  0x13   :  { %s47_s19 = sshll.u32 %s1498_s18, 4  ;;  %s37_s20 = sshll.u32 %s1499_s0, 4  ;;  %s48_s19 = int_to_ptr.vmem [resolvable:$true] %s47_s19  ;;  %s38_s20 = int_to_ptr.vmem [resolvable:$true] %s37_s20 }
  0x14   :  { %s1377_s23 = scalar_lea.hbm %s1898_s3, 32 }
  0x15   :  { %p1378_p5 = scmp.ne.s32.totalorder %s1898_s3, %s1377_s23  ;;  %p1381_p6 = scmp.lt.u32.totalorder %s1377_s23, %s1898_s3 }
  0x17   :  { %p1383_p7 = pnand %p1381_p6, %p1378_p5 }
  0x19   :  { %1386 = shalt.err (!%p1383_p7)
}
  0x1a   :  { %s1387_s28 = scalar_lea.vmem %s48_s19, 32  ;;  %p1392_p9 = scmp.lt.s32.totalorder %s48_s19, %s48_s19 }
  0x1b   :  { %p1388_p8 = scmp.ne.s32.totalorder %s48_s19, %s1387_s28  ;;  %p1393_p10 = scmp.lt.s32.totalorder %s1387_s28, %s1387_s28 }
  0x1d   :  { %p1394_p11 = por %p1393_p10, %p1392_p9 }
  0x1f   :  { %p1395_p12 = pnand %p1394_p11, %p1388_p8 }
  0x21   :  { %1398 = shalt.err (!%p1395_p12)
}
  0x22   :  { %50 = dma.hbm_to_vmem [thread:$0]  %s1898_s3, 32, %s48_s19, [#allocation8]  }
  0x23   :  { %s1399_s17 = scalar_lea.hbm %s1897_s2, 128 }
  0x24   :  { %p1400_p13 = scmp.ne.s32.totalorder %s1897_s2, %s1399_s17  ;;  %p1403_p0 = scmp.lt.u32.totalorder %s1399_s17, %s1897_s2 }
  0x26   :  { %p1405_p1 = pnand %p1403_p0, %p1400_p13 }
  0x28   :  { %1408 = shalt.err (!%p1405_p1)
}
  0x29   :  { %s1409_s23 = scalar_lea.vmem %s38_s20, 128  ;;  %p1414_p3 = scmp.lt.s32.totalorder %s38_s20, %s38_s20 }
  0x2a   :  { %p1410_p2 = scmp.ne.s32.totalorder %s38_s20, %s1409_s23  ;;  %p1415_p4 = scmp.lt.s32.totalorder %s1409_s23, %s1409_s23 }
  0x2c   :  { %p1416_p5 = por %p1415_p4, %p1414_p3 }
  0x2e   :  { %p1417_p6 = pnand %p1416_p5, %p1410_p2 }
  0x30   :  { %1420 = shalt.err (!%p1417_p6)
}
  0x31   :  { %40 = dma.hbm_to_vmem [thread:$0]  %s1897_s2, 128, %s38_s20, [#allocation5]  }
  0x32   :  { %s1500_s24 = smov [#allocation9]   ;;  %s1501_s26 = smov [#allocation10]  }
  0x33   :  { %s61_s25 = sshll.u32 %s1500_s24, 4  ;;  %s80_s27 = sshll.u32 %s1501_s26, 4  ;;  %s62_s25 = int_to_ptr.vmem [resolvable:$true] %s61_s25  ;;  %s1611_s27 = int_to_ptr.vmem [resolvable:$true] %s80_s27 }
  0x34   :  { %s1421_s30 = scalar_lea.hbm %s1901_s6, 16 }
  0x35   :  { %p1422_p7 = scmp.ne.s32.totalorder %s1901_s6, %s1421_s30  ;;  %p1425_p8 = scmp.lt.u32.totalorder %s1421_s30, %s1901_s6 }
  0x37   :  { %p1427_p9 = pnand %p1425_p8, %p1422_p7 }
  0x39   :  { %1430 = shalt.err (!%p1427_p9)
}
  0x3a   :  { %s1431_s2 = scalar_lea.vmem %s62_s25, 16  ;;  %s1435_s20 = scalar_lea.vmem %s62_s25, 32 }
  0x3b   :  { %p1432_p10 = scmp.ne.s32.totalorder %s62_s25, %s1431_s2  ;;  %p1436_p11 = scmp.lt.s32.totalorder %s62_s25, %s62_s25 }
  0x3c   :  { %p1437_p12 = scmp.lt.s32.totalorder %s1435_s20, %s1431_s2 }
  0x3e   :  { %p1438_p13 = por %p1437_p12, %p1436_p11 }
  0x40   :  { %p1439_p0 = pnand %p1438_p13, %p1432_p10 }
  0x42   :  { %1442 = shalt.err (!%p1439_p0)
}
  0x43   :  { %64 = dma.hbm_to_vmem [thread:$0]  %s1901_s6, 16, %s62_s25, [#allocation8]  }
  0x44   :  { %s1443_s3 = scalar_lea.hbm %s1907_s12, 512 }
  0x45   :  { %p1444_p1 = scmp.ne.s32.totalorder %s1907_s12, %s1443_s3  ;;  %p1447_p2 = scmp.lt.u32.totalorder %s1443_s3, %s1907_s12 }
  0x47   :  { %p1449_p3 = pnand %p1447_p2, %p1444_p1 }
  0x49   :  { %1452 = shalt.err (!%p1449_p3)
}
  0x4a   :  { %s1453_s29 = scalar_lea.vmem %s1611_s27, 512  ;;  %p1458_p5 = scmp.lt.s32.totalorder %s1611_s27, %s1611_s27 }
  0x4b   :  { %p1454_p4 = scmp.ne.s32.totalorder %s1611_s27, %s1453_s29  ;;  %p1459_p6 = scmp.lt.s32.totalorder %s1453_s29, %s1453_s29 }
  0x4d   :  { %p1460_p7 = por %p1459_p6, %p1458_p5 }
  0x4f   :  { %p1461_p8 = pnand %p1460_p7, %p1454_p4 }
  0x51   :  { %1464 = shalt.err (!%p1461_p8)
}
  0x52   :  { %s1502_s6 = smov 128   ;;  %s1503_s25 = smov 8  }
  0x53   :  { %86 = dma.hbm_to_vmem [thread:$0]  %s1907_s12, 512, %s1611_s27, [#allocation11], %s1502_s6, %s1502_s6, %s1503_s25  }
  0x54   :  { %1489 = dma.done.wait [#allocation5], 128  }
  0x55   :  { %1490 = vsyncadd [#allocation5], 4294967168 }
  0x56   :  { %1491 = dma.done.wait [#allocation8], 48  }
  0x57   :  { %1492 = vsyncadd [#allocation8], 4294967248 }
  0x58   :  { %1493 = dma.done.wait [#allocation11], 512  }
  0x59   :  { %1494 = vsyncadd [#allocation11], 4294966784  ;;  %v101_v0 = vlaneseq  ;;  %s1642_s16 = sld [smem:[#allocation3]]  ;;  %s1644_s17 = sld [smem:[#allocation3 + $0x1]]  ;;  %v1504_v2 = vmov 0.0|0.0   ;;  %vm1505_vm0 = vmmov 0  }
  0x5a   :  { %s1649_s18 = sld [smem:[#allocation3 + $0x2]]  ;;  %s1651_s2 = sld [smem:[#allocation3 + $0x3]]  ;;  %1301 = vmatprep.subr.bf16.mxu1 %v1504_v2  ;;  %v1506_v3 = vmov 0.0   ;;  %vm293_vm1 = vcmask 64512   ;;  %v292_v6 = vld [vmem:[#allocation4] sm:$0xff]  ;;  %v281_v11 = vld [vmem:[%s1896_s1 + $0x8] sm:$0xff] }
  0x5b   :  { %v1647_v1 = vshrl.u32 %v101_v0, 7  ;;  %1229 = vmatprep.mubr.msk.f32.mxu1 %vm1505_vm0, %v1506_v3  ;;  %s1656_s12 = sld [smem:[#allocation3 + $0x4]]  ;;  %s1658_s27 = sld [smem:[#allocation3 + $0x5]]  ;;  %v288_v7 = vld [vmem:[%s1899_s4] sm:$0xff]  ;;  %1191 = vmatprep.subr.mxu0 %v292_v6  ;;  %v289_v12 = vld [vmem:[%s1899_s4 + $0x8] sm:$0xff]  ;;  %v282_v13 = vld [vmem:[%s1896_s1 + $0x10] sm:$0xff] }
  0x5c   :  { %s1663_s20 = sld [smem:[#allocation3 + $0x6]]  ;;  %s1668_s0 = sld [smem:[#allocation3 + $0x80]]  ;;  %v280_v8 = vld [vmem:[%s1896_s1] sm:$0xff]  ;;  %1193 = vmatprep.mubr.msk.f32.mxu0 %vm293_vm1, %v288_v7  ;;  %1192 = vmatpush3.msra.mxu0 %v292_v6  ;;  %v283_v17 = vld [vmem:[%s1896_s1 + $0x18] sm:$0xff]  ;;  %v285_v19 = vld [vmem:[%s1896_s1 + $0x28] sm:$0xff]  ;;  %v107_v44 = vand.u32 127, %v101_v0 }
  0x5d   :  { %v1661_v4 = vadd.s32 8, %v1647_v1  ;;  %v1666_v5 = vadd.s32 24, %v1647_v1  ;;  %s1670_s21 = sld [smem:[#allocation3 + $0x81]]  ;;  %s1674_s22 = sld [smem:[#allocation3 + $0x7]]  ;;  %v1285_v16 = vpack.c.bf16 %v281_v11, %v280_v8  ;;  %v284_v18 = vld [vmem:[%s1896_s1 + $0x20] sm:$0xff]  ;;  %1194 = vmatmul.mubr.msk.f32.vlgmr.msra.gmra.mrb[0].mxu0 %vm293_vm1, %v289_v12  ;;  %v1289_v22 = vpack.c.bf16 %v283_v17, %v282_v13  ;;  %v290_v23 = vld [vmem:[%s1899_s4 + $0x10] sm:$0xff] }
  0x5e   :  { %s1676_s23 = sld [smem:[#allocation3 + $0x82]]  ;;  %v1293_v26 = vpack.c.bf16 %v285_v19, %v284_v18  ;;  %1196 = vmatprep.mubr.msk.f32.mxu0 %vm293_vm1, %v290_v23  ;;  %v291_v27 = vld [vmem:[%s1899_s4 + $0x18] sm:$0xff]  ;;  %s1738_s30 = sld [smem:[#allocation3 + $0x86]]  ;;  %v286_v36 = vld [vmem:[%s1896_s1 + $0x30] sm:$0xff]  ;;  %v490_v47 = vld [vmem:[%s1900_s5] sm:$0xff] }
  0x5f   :  { %vm109_vm2 = vcmp.eq.s32.totalorder %v1661_v4, 8  ;;  %vm119_vm3 = vcmp.eq.s32.totalorder %v1661_v4, 9  ;;  %v113_v9 = vstv %s1642_s16  ;;  %v123_v10 = vstv %s1644_s17  ;;  %1286 = vmatprep.subr.bf16.mxu0 %v1285_v16  ;;  %s1745_s4 = sld [smem:[#allocation3 + $0x87]]  ;;  %v287_v37 = vld [vmem:[%s1896_s1 + $0x38] sm:$0xff]  ;;  %v491_v48 = vld [vmem:[%s1900_s5 + $0x8] sm:$0xff]  ;;  %s1508_s26 = smov [#allocation12]  }
  0x60   :  { %vm129_vm4 = vcmp.eq.s32.totalorder %v1661_v4, 10  ;;  %vm139_vm5 = vcmp.eq.s32.totalorder %v1661_v4, 11  ;;  %v115_v14 = vsel %vm109_vm2, %v113_v9, 4294967295  ;;  %v133_v15 = vstv %s1649_s18  ;;  %s1716_s18 = sld [smem:[#allocation3 + $0x83]]  ;;  %1288 = vmatpush3.bf16.msra.mxu0 %v1285_v16  ;;  %v492_v55 = vld [vmem:[%s1900_s5 + $0x10] sm:$0xff]  ;;  %v493_v56 = vld [vmem:[%s1900_s5 + $0x18] sm:$0xff] }
  0x61   :  { %vm149_vm6 = vcmp.eq.s32.totalorder %v1661_v4, 12  ;;  %vm159_vm7 = vcmp.eq.s32.totalorder %v1661_v4, 13  ;;  %v125_v20 = vsel %vm119_vm3, %v123_v10, %v115_v14  ;;  %v143_v21 = vstv %s1651_s2  ;;  %s1726_s2 = sld [smem:[#allocation3 + $0x84]]  ;;  %1290 = vmatprep.subr.bf16.mxu0 %v1289_v22  ;;  %1197 = vmatmul.mubr.msk.f32.gmra.mrb[2].mxu0 %vm293_vm1, %v291_v27  ;;  %v575_v60 = vld [vmem:[%s1902_s7] sm:$0xff]  ;;  %v576_v61 = vld [vmem:[%s1902_s7 + $0x8] sm:$0xff]  ;;  %v685_v16 = vld [vmem:[%s1904_s9 + $0x10] sm:$0xff] }
  0x62   :  { %vm169_vm8 = vcmp.eq.s32.totalorder %v1661_v4, 14  ;;  %v135_v24 = vsel %vm129_vm4, %v133_v15, %v125_v20  ;;  %v153_v25 = vstv %s1656_s12  ;;  %vm191_vm9 = vcmp.eq.s32.totalorder %v1666_v5, 24  ;;  %s1736_s12 = sld [smem:[#allocation3 + $0x85]]  ;;  %1215 = vmatprep.mubr.f32.mxu0 %v1506_v3  ;;  %v489_v7 = vld [vmem:[#allocation7] sm:$0x3]  ;;  %v683_v10 = vld [vmem:[%s1904_s9] sm:$0xff] }
  0x63   :  { %v145_v28 = vsel %vm139_vm5, %v143_v21, %v135_v24  ;;  %v163_v29 = vstv %s1658_s27  ;;  %vm179_vm10 = vcmp.eq.s32.totalorder %v1661_v4, 15  ;;  %v173_v31 = vstv %s1663_s20  ;;  %v577_v4 = vld [vmem:[%s1902_s7 + $0x10] sm:$0xff]  ;;  %v684_v11 = vld [vmem:[%s1904_s9 + $0x8] sm:$0xff] }
  0x64   :  { %v155_v30 = vsel %vm149_vm6, %v153_v25, %v145_v28  ;;  %v193_v32 = vstv %s1668_s0  ;;  %vm201_vm11 = vcmp.eq.s32.totalorder %v1666_v5, 25  ;;  %v203_v35 = vstv %s1670_s21  ;;  %1292 = vmatpush3.bf16.msra.mxu0 %v1289_v22  ;;  %v816_v13 = vld [vmem:[%s1906_s11] sm:$0xff]  ;;  %v817_v14 = vld [vmem:[%s1906_s11 + $0x8] sm:$0xff] }
  0x65   :  { %v165_v33 = vsel %vm159_vm7, %v163_v29, %v155_v30  ;;  %v197_v34 = vsel %vm191_vm9, %v193_v32, 4294967295  ;;  %vm211_vm12 = vcmp.eq.s32.totalorder %v1666_v5, 26  ;;  %v183_v38 = vstv %s1674_s22  ;;  %1294 = vmatprep.subr.bf16.mxu0 %v1293_v26  ;;  %v686_v17 = vld [vmem:[%s1904_s9 + $0x18] sm:$0xff]  ;;  %v818_v25 = vld [vmem:[%s1906_s11 + $0x10] sm:$0xff] }
  0x66   :  { %v207_v39 = vsel %vm201_vm11, %v203_v35, %v197_v34  ;;  %v213_v40 = vstv %s1676_s23  ;;  %vm221_vm13 = vcmp.eq.s32.totalorder %v1666_v5, 27  ;;  %v175_v41 = vsel %vm169_vm8, %v173_v31, %v165_v33  ;;  %v1122_v31 = vld [vmem:[#allocation9] ss:$0 sm:$0xff] }
  0x67   :  { %v217_v42 = vsel %vm211_vm12, %v213_v40, %v207_v39  ;;  %v223_v43 = vstv %s1716_s18  ;;  %vm231_vm14 = vcmp.eq.s32.totalorder %v1666_v5, 28  ;;  %v233_v46 = vstv %s1726_s2  ;;  %s1088_s18 = sshll.u32 %s1508_s26, 4  ;;  %s1089_s18 = int_to_ptr.vmem [resolvable:$true] %s1088_s18 }
  0x68   :  { %v227_v45 = vsel %vm221_vm13, %v223_v43, %v217_v42  ;;  %vm241_vm15 = vcmp.eq.s32.totalorder %v1666_v5, 29  ;;  %v1297_v49 = vpack.c.bf16 %v287_v37, %v286_v36  ;;  %v243_v51 = vstv %s1736_s12  ;;  %1296 = vmatpush3.bf16.msra.mxu0 %v1293_v26  ;;  %v819_v26 = vld [vmem:[%s1906_s11 + $0x18] sm:$0xff]  ;;  %v1124_v37 = vld [vmem:[%s1903_s8] ss:$0 sm:$0xff]  ;;  %s1465_s28 = scalar_lea.vmem %s1089_s18, 32  ;;  %p1470_p10 = scmp.lt.s32.totalorder %s1089_s18, %s1089_s18 }
  0x69   :  { %v237_v50 = vsel %vm231_vm14, %v233_v46, %v227_v45  ;;  %vm251_vm1 = vcmp.eq.s32.totalorder %v1666_v5, 30  ;;  %v185_v52 = vsel %vm179_vm10, %v183_v38, %v175_v41  ;;  %v253_v54 = vstv %s1738_s30  ;;  %p1466_p9 = scmp.ne.s32.totalorder %s1089_s18, %s1465_s28  ;;  %p1471_p11 = scmp.lt.s32.totalorder %s1465_s28, %s1465_s28 }
  0x6a   :  { %v247_v53 = vsel %vm241_vm15, %v243_v51, %v237_v50  ;;  %vm261_vm2 = vcmp.eq.s32.totalorder %v1666_v5, 31  ;;  %v263_v58 = vstv %s1745_s4  ;;  %v1302_v59 = vpack.c.bf16 %v491_v48, %v490_v47  ;;  %1298 = vmatprep.subr.bf16.mxu0 %v1297_v49  ;;  %v578_v5 = vld [vmem:[%s1902_s7 + $0x18] sm:$0xff] }
  0x6b   :  { %v257_v57 = vsel %vm251_vm1, %v253_v54, %v247_v53  ;;  %vm269_vm3 = vcmp.eq.s32.totalorder %v107_v44, %v185_v52  ;;  %v1305_v62 = vpack.c.bf16 %v493_v56, %v492_v55  ;;  %v1307_v0 = vpack.c.bf16 %v576_v61, %v575_v60  ;;  %v993_v56 = vld [vmem:[#allocation10] sm:$0xff]  ;;  %v996_v60 = vld [vmem:[#allocation10 + $0x18] sm:$0xff]  ;;  %p1472_p12 = por %p1471_p11, %p1470_p10 }
  0x6c   :  { %1303 = vmatpush3.bf16.msra.mxu1 %v1302_v59  ;;  %v267_v63 = vsel %vm261_vm2, %v263_v58, %v257_v57  ;;  %1300 = vmatpush3.bf16.msra.mxu0 %v1297_v49  ;;  %v1114_v6 = vsel %vm269_vm3, 1.0, %v1506_v3  ;;  %vm391_vm4 = vcmask 523264   ;;  %vm501_vm6 = vcmask 261120   ;;  %v994_v57 = vld [vmem:[#allocation10 + $0x8] sm:$0xff]  ;;  %v995_v58 = vld [vmem:[#allocation10 + $0x10] sm:$0xff] }
  0x6d   :  { %1304 = vmatprep.subr.bf16.mxu1 %v1504_v2  ;;  %vm271_vm5 = vcmp.eq.s32.totalorder %v107_v44, %v267_v63  ;;  %v1311_v8 = vpack.c.bf16 %v578_v5, %v577_v4  ;;  %v1315_v12 = vpack.c.bf16 %v684_v11, %v683_v10  ;;  %v1323_v15 = vpack.c.bf16 %v817_v14, %v816_v13  ;;  %p1473_p13 = pnand %p1472_p12, %p1466_p9 }
  0x6e   :  { %v1115_v9 = vsel %vm271_vm5, 1.0, %v1506_v3  ;;  %v1319_v20 = vpack.c.bf16 %v686_v17, %v685_v16  ;;  %v1327_v27 = vpack.c.bf16 %v819_v26, %v818_v25  ;;  %v1507_v28 = vmov 1966171168  }
  0x6f   :  { %1216 = vmatmul.mubr.msk.f32.vlgmr.msra.gmra.mrb[0].mxu0 %vm391_vm4, %v1114_v6  ;;  %1324 = vmatprep.subr.bf16.mxu0 %v1323_v15  ;;  %v781_v29 = vunpack.c.l.s4 %v1507_v28  ;;  %v804_v35 = vsub.s32 0, %v1647_v1  ;;  %v1332_v59 = vpack.c.bf16 %v994_v57, %v993_v56  ;;  %v1335_v61 = vpack.c.bf16 %v996_v60, %v995_v58 }
  0x70   :  { %1306 = vmatpush3.bf16.msra.mxu1 %v1305_v62  ;;  %1218 = vmatprep.mubr.f32.mxu0 %v1506_v3  ;;  %vm1080_vm7 = vcmask 254976  }
  0x71   :  { %1308 = vmatprep.subr.bf16.mxu1 %v1307_v0  ;;  %1326 = vmatpush3.bf16.msra.mxu0 %v1323_v15  ;;  %v782_v30 = vunpack.c.0.s8 %v781_v29 }
  0x72   :  { %1328 = vmatprep.subr.bf16.mxu0 %v1327_v27 }
  0x73   :  { %1230 = vmatmul.mubr.msk.f32.vlgmr.msra.gmra.mrb[0].mxu1 %vm501_vm6, %v489_v7  ;;  %1219 = vmatmul.mubr.msk.f32.gmra.mrb[2].mxu0 %vm391_vm4, %v1115_v9  ;;  %v785_v33 = vsub.s32 %v782_v30, %v1647_v1 }
  0x74   :  { %1310 = vmatpush3.bf16.msra.mxu1 %v1307_v0 }
  0x75   :  { %1312 = vmatprep.subr.bf16.mxu1 %v1311_v8  ;;  %1330 = vmatpush3.bf16.msra.mxu0 %v1327_v27 }
  0x78   :  { %1314 = vmatpush3.bf16.msra.mxu1 %v1311_v8 }
  0x79   :  { %1316 = vmatprep.subr.bf16.mxu1 %v1315_v12 }
 0x142   :  { %v1217_v18 = vpop.f32.mrb[0].mxu0 }
 0x143   :  { %v470_v19 = vpop.f32.mrb[1].mxu0 }
 0x144   :  { %1240 = vmatprep.mubr.msk.f32.mxu1 %vm501_vm6, %v470_v19 }
 0x145   :  { %1241 = vmatmul.mubr.msk.f32.vlgmr.msra.gmra.mrb[2].mxu1 %vm501_vm6, %v1217_v18 }
 0x146   :  { %v571_v21 = vpop.f32.mrb[0].mxu1  ;;  %v1220_v23 = vpop.f32.mrb[2].mxu0  ;;  %1318 = vmatpush3.bf16.msra.mxu1 %v1315_v12 }
 0x147   :  { %v1231_v22 = vpop.f32.mrb[1].mxu1  ;;  %v480_v24 = vpop.f32.mrb[3].mxu0  ;;  %1320 = vmatprep.subr.bf16.mxu1 %v1319_v20  ;;  %v572_v32 = vadd.f32 %v1122_v31, %v571_v21 }
 0x148   :  { %1243 = vmatprep.mubr.msk.f32.mxu1 %vm501_vm6, %v480_v24 }
 0x149   :  { %1244 = vmatmul.mubr.msk.f32.gmra.mrb[4].mxu1 %vm501_vm6, %v1220_v23  ;;  %v786_v34 = vrot.slane %v572_v32, %v785_v33 }
 0x14a   :  { %1322 = vmatpush3.bf16.msra.mxu1 %v1319_v20  ;;  %1254 = vmatprep.mubr.msk.f32.mxu1 %vm501_vm6, %v470_v19 }
 0x14b   :  { %1331 = vmatprep.subr.bf16.mxu1 %v1504_v2  ;;  %v787_v36 = vcombine.high %v786_v34, %v786_v34 }
 0x14d   :  { %1255 = vmatmul.mubr.msk.f32.vlgmr.msra.gmra.mrb[6].mxu1 %vm501_vm6, %v1217_v18  ;;  %v801_v42 = vrot.slane %v787_v36, %v785_v33 }
 0x14e   :  { %1257 = vmatprep.mubr.msk.f32.mxu1 %vm501_vm6, %v480_v24  ;;  %1333 = vmatpush3.bf16.msra.mxu1 %v1332_v59 }
 0x14f   :  { %v809_v48 = vrot.slane %v801_v42, %v804_v35  ;;  %1334 = vmatprep.subr.bf16.mxu1 %v1504_v2 }
 0x151   :  { %1258 = vmatmul.mubr.msk.f32.gmra.mrb[8].mxu1 %vm501_vm6, %v1220_v23 }
 0x152   :  { %1282 = vmatprep.mubr.msk.f32.mxu1 %vm1505_vm0, %v1506_v3  ;;  %v794_v3 = vrot.slane %v786_v34, %v785_v33  ;;  %1336 = vmatpush3.bf16.msra.mxu1 %v1335_v61  ;;  %vm1006_vm0 = vcmask 1041409  }
 0x154   :  { %v805_v38 = vrot.slane %v794_v3, %v804_v35 }
 0x218   :  { %v1242_v39 = vpop.f32.mrb[2].mxu1 }
 0x219   :  { %v670_v40 = vadd.f32 %v1242_v39, %v1124_v37  ;;  %v664_v41 = vpop.f32.mrb[3].mxu1 }
 0x21a   :  { %v665_v43 = vadd.f32 %v1124_v37, %v664_v41 }
 0x21b   :  { %v813_v44 = vmul.f32 %v805_v38, %v670_v40 }
 0x21c   :  { %v812_v45 = vmul.f32 %v805_v38, %v665_v43  ;;  %v1245_v46 = vpop.f32.mrb[4].mxu1 }
 0x21d   :  { %v680_v47 = vadd.f32 %v1245_v46, %v1124_v37  ;;  %v674_v49 = vpop.f32.mrb[5].mxu1 }
 0x21e   :  { %v675_v50 = vadd.f32 %v1124_v37, %v674_v49  ;;  %1268 = vmatprep.mubr.msk.f32.mxu0 %vm501_vm6, %v812_v45 }
 0x21f   :  { %v815_v1 = vmul.f32 %v809_v48, %v680_v47  ;;  %1269 = vmatmul.mubr.msk.f32.vlgmr.msra.gmra.mrb[4].mxu0 %vm501_vm6, %v813_v44 }
 0x220   :  { %v814_v51 = vmul.f32 %v809_v48, %v675_v50  ;;  %v1849_v52 = vpop.f32.mrb[6].mxu1 }
 0x221   :  { %v1851_v53 = vpop.f32.mrb[7].mxu1 }
 0x222   :  { %1271 = vmatprep.mubr.msk.f32.mxu0 %vm501_vm6, %v814_v51 }
 0x223   :  { %1272 = vmatmul.mubr.msk.f32.gmra.mrb[6].mxu0 %vm501_vm6, %v815_v1  ;;  %v1129_v1 = vld [vmem:[%s1905_s10] ss:$0 sm:$0xff] }
 0x224   :  { %v1855_v54 = vpop.f32.mrb[8].mxu1  ;;  %v766_v56 = vadd.f32 %v1849_v52, %v1129_v1  ;;  %v761_v57 = vadd.f32 %v1129_v1, %v1851_v53 }
 0x225   :  { %v1857_v55 = vpop.f32.mrb[9].mxu1 }
 0x2f2   :  { %v1270_v62 = vpop.f32.mrb[4].mxu0 }
 0x2f3   :  { %v918_v63 = vsel %vm501_vm6, %v1270_v62, -inf  ;;  %v898_v0 = vpop.f32.mrb[5].mxu0 }
 0x2f4   :  { %v917_v4 = vsel %vm501_vm6, %v898_v0, -inf }
 0x2f5   :  { %v919_v5 = vmax.f32 %v917_v4, %v918_v63  ;;  %v776_v63 = vadd.f32 %v1855_v54, %v1129_v1 }
 0x2f6   :  { %v1273_v6 = vpop.f32.mrb[6].mxu0 }
 0x2f7   :  { %v920_v7 = vrot.slane %v919_v5, 4  ;;  %v927_v8 = vsel %vm501_vm6, %v1273_v6, -inf  ;;  %v908_v9 = vpop.f32.mrb[7].mxu0 }
 0x2f8   :  { %v926_v10 = vsel %vm501_vm6, %v908_v9, -inf }
 0x2f9   :  { %v921_v11 = vmax.f32 %v919_v5, %v920_v7  ;;  %v928_v12 = vmax.f32 %v926_v10, %v927_v8 }
 0x2fb   :  { %v922_v13 = vrot.slane %v921_v11, 2  ;;  %v929_v14 = vrot.slane %v928_v12, 4 }
 0x2fd   :  { %v923_v2 = vmax.f32 %v921_v11, %v922_v13  ;;  %v930_v15 = vmax.f32 %v928_v12, %v929_v14 }
 0x2ff   :  { %v924_v16 = vrot.slane %v923_v2, 1  ;;  %v931_v17 = vrot.slane %v930_v15, 2 }
 0x301   :  { %v925_v18 = vmax.f32 %v923_v2, %v924_v16  ;;  %v932_v19 = vmax.f32 %v930_v15, %v931_v17 }
 0x303   :  { %v935_v20 = vsub.f32 %v898_v0, %v925_v18  ;;  %v936_v21 = vsub.f32 %v1270_v62, %v925_v18  ;;  %v933_v22 = vrot.slane %v932_v19, 1  ;;  %v771_v0 = vadd.f32 %v1129_v1, %v1857_v55 }
 0x305   :  { %v939_v23 = vmul.f32 1.442695, %v935_v20  ;;  %v941_v24 = vmul.f32 1.442695, %v936_v21  ;;  %v934_v25 = vmax.f32 %v932_v19, %v933_v22  ;;  %v1138_v22 = vld [vmem:[%s1908_s13] ss:$0 sm:$0xff] }
 0x307   :  { %1353 = vpow2.f32 %v939_v23  ;;  %v937_v26 = vsub.f32 %v908_v9, %v934_v25  ;;  %v938_v27 = vsub.f32 %v1273_v6, %v934_v25 }
 0x308   :  { %1355 = vpow2.f32 %v941_v24 }
 0x309   :  { %v943_v28 = vmul.f32 1.442695, %v937_v26  ;;  %v945_v29 = vmul.f32 1.442695, %v938_v27 }
 0x30b   :  { %1357 = vpow2.f32 %v943_v28 }
 0x30c   :  { %1359 = vpow2.f32 %v945_v29 }
 0x311   :  { %v1354_v30 = vpop.eup %1353 }
 0x312   :  { %v1356_v31 = vpop.eup %1355  ;;  %v947_v32 = vsel %vm501_vm6, %v1354_v30, 0.0 }
 0x313   :  { %v948_v33 = vsel %vm501_vm6, %v1356_v31, 0.0 }
 0x314   :  { %v949_v34 = vadd.f32 %v948_v33, %v947_v32 }
 0x315   :  { %v1358_v3 = vpop.eup %1357 }
 0x316   :  { %v1360_v35 = vpop.eup %1359  ;;  %v950_v36 = vrot.slane %v949_v34, 4  ;;  %v956_v37 = vsel %vm501_vm6, %v1358_v3, 0.0 }
 0x317   :  { %v957_v38 = vsel %vm501_vm6, %v1360_v35, 0.0 }
 0x318   :  { %v951_v39 = vadd.f32 %v950_v36, %v949_v34  ;;  %v958_v40 = vadd.f32 %v957_v38, %v956_v37 }
 0x31a   :  { %v952_v41 = vrot.slane %v951_v39, 2  ;;  %v959_v42 = vrot.slane %v958_v40, 4 }
 0x31c   :  { %v953_v43 = vadd.f32 %v952_v41, %v951_v39  ;;  %v960_v44 = vadd.f32 %v959_v42, %v958_v40 }
 0x31e   :  { %v954_v45 = vrot.slane %v953_v43, 1  ;;  %v961_v46 = vrot.slane %v960_v44, 2 }
 0x320   :  { %v955_v47 = vadd.f32 %v954_v45, %v953_v43  ;;  %v962_v48 = vadd.f32 %v961_v46, %v960_v44 }
 0x322   :  { %1361 = vrcp.f32 %v955_v47  ;;  %v963_v49 = vrot.slane %v962_v48, 1 }
 0x324   :  { %v964_v50 = vadd.f32 %v963_v49, %v962_v48 }
 0x326   :  { %1363 = vrcp.f32 %v964_v50 }
 0x32c   :  { %v1362_v51 = vpop.eup %1361 }
 0x32d   :  { %v966_v58 = vmul.f32 %v1362_v51, %v1354_v30  ;;  %v967_v59 = vmul.f32 %v1362_v51, %v1356_v31 }
 0x32f   :  { %v971_v60 = vmul.f32 %v966_v58, %v761_v57  ;;  %v972_v61 = vmul.f32 %v967_v59, %v766_v56 }
 0x330   :  { %v1364_v62 = vpop.eup %1363 }
 0x331   :  { %v975_v4 = vsel %vm501_vm6, %v971_v60, 0.0  ;;  %v976_v5 = vsel %vm501_vm6, %v972_v61, 0.0  ;;  %v969_v6 = vmul.f32 %v1364_v62, %v1358_v3  ;;  %v970_v7 = vmul.f32 %v1364_v62, %v1360_v35 }
 0x332   :  { %v977_v8 = vadd.f32 %v976_v5, %v975_v4 }
 0x333   :  { %v973_v9 = vmul.f32 %v969_v6, %v771_v0  ;;  %v974_v52 = vmul.f32 %v970_v7, %v776_v63 }
 0x334   :  { %v978_v10 = vrot.slane %v977_v8, 4 }
 0x335   :  { %v984_v53 = vsel %vm501_vm6, %v973_v9, 0.0  ;;  %v985_v11 = vsel %vm501_vm6, %v974_v52, 0.0 }
 0x336   :  { %v986_v12 = vadd.f32 %v985_v11, %v984_v53  ;;  %v979_v13 = vadd.f32 %v978_v10, %v977_v8 }
 0x338   :  { %v980_v14 = vrot.slane %v979_v13, 2  ;;  %v987_v54 = vrot.slane %v986_v12, 4 }
 0x33a   :  { %v981_v2 = vadd.f32 %v980_v14, %v979_v13  ;;  %v988_v55 = vadd.f32 %v987_v54, %v986_v12 }
 0x33c   :  { %v989_v15 = vrot.slane %v988_v55, 2  ;;  %v982_v16 = vrot.slane %v981_v2, 1 }
 0x33e   :  { %v990_v17 = vadd.f32 %v989_v15, %v988_v55  ;;  %v983_v19 = vadd.f32 %v982_v16, %v981_v2 }
 0x340   :  { %v991_v18 = vrot.slane %v990_v17, 1 }
 0x342   :  { %v992_v20 = vadd.f32 %v991_v18, %v990_v17 }
 0x344   :  { %v1007_v21 = vsel %vm1006_vm0, %v992_v20, %v983_v19 }
 0x345   :  { %1283 = vmatmul.mubr.msk.f32.vlgmr.msra.gmra.mrb[10].mxu1 %vm501_vm6, %v1007_v21 }
 0x418   :  { %v1076_v23 = vpop.f32.mrb[10].mxu1 }
 0x419   :  { %v1077_v24 = vadd.f32 %v1138_v22, %v1076_v23  ;;  %v1284_v25 = vpop.f32.mrb[11].mxu1 }
 0x41b   :  { %1081 = vst.msk [vmem:[#allocation12] sm:$0x3] %vm1080_vm7, %v1077_v24 }
 0x41c   :  { %1476 = shalt.err (!%p1473_p13)
}
 0x41d   :  { %s1477_s2 = scalar_lea.hbm %s1909_s14, 32 }
 0x41e   :  { %p1478_p0 = scmp.ne.s32.totalorder %s1909_s14, %s1477_s2  ;;  %p1481_p1 = scmp.lt.u32.totalorder %s1477_s2, %s1909_s14 }
 0x420   :  { %p1483_p2 = pnand %p1481_p1, %p1478_p0 }
 0x422   :  { %1486 = shalt.err (!%p1483_p2)
}
 0x423   :  { %1091 = dma.vmem_to_hbm [thread:$0]  %s1089_s18, 32, %s1909_s14, [#allocation6]  }
 0x424   :  { %1495 = dma.done.wait [#allocation6], 32  }
 0x425   :  { %1496 = vsyncadd [#allocation6], 4294967264 }
 0x426   :  { %1095 = vsyncpa [#allocation5], 1 }
 0x427   :  { %1096 = vsyncpa [#allocation8], 1 }
 0x428   :  { %1097 = vsyncpa [#allocation11], 1 }
 0x429   :  { %1098 = vsyncpa [#allocation6], 1 }

</bundles_post_ra>
